<compile_context>
chip_gen: v6e
topology: v6e:2x2x1
jax: 0.10.0
libtpu: 0.0.40
codegen_flags: <defaults>
</compile_context>

<pallas_src>
import functools

import jax
import jax.numpy as jnp
from jax import lax
from jax.experimental import pallas as pl
from jax.experimental.pallas import tpu as pltpu

MARGIN = 0.1
EPS = 1e-6

_LANES = 128
_SUBLANES = 8


def _round_up(x, m):
    return ((x + m - 1) // m) * m


def _sublane_pack(itemsize):
    """Rows per packed vreg tile: f32 -> 8, bf16 -> 16, int8/fp8 -> 32."""
    return max(_SUBLANES, (4 * _SUBLANES) // int(itemsize))


def _input_vmem_budget_bytes():
    """Per-generation budget for the pipelined *input* working set."""
    try:
        kind = jax.devices()[0].device_kind.lower()
    except Exception:  # pragma: no cover - defensive
        kind = ""
    mib = 1024 * 1024
    if "v5 lite" in kind or "v5lite" in kind or "v5e" in kind:
        return 14 * mib  # v5e: 16 MiB default scoped VMEM is the binding limit
    if "v6" in kind:
        return 26 * mib  # v6e: 128 MiB physical; raise the scoped limit explicitly
    if "v7" in kind:
        return 24 * mib  # v7x: only 64 MiB physical VMEM per TensorCore
    return 16 * mib      # unknown generation: stay conservative


def _plan_tiling(batch, feat, itemsize, budget, num_buffers):
    """Choose (tile_b, chunk_d) for 3 pipelined inputs under the VMEM budget."""
    pack = _sublane_pack(itemsize)
    bytes_per_row_full_d = 3 * num_buffers * feat * itemsize

    if batch <= pack:
        tile_b = batch  # one block; the block dim equals the full array dim
    else:
        # Largest affordable row tile with the full feature dim resident ...
        affordable = max(pack, ((budget // bytes_per_row_full_d) // pack) * pack)
        # ... but keep >= 4 grid steps over the batch (2 per v7x TensorCore and
        # DMA/compute overlap on every generation), never below one packed vreg.
        parallel_cap = max(pack, _round_up(pl.cdiv(batch, 4), pack))
        tile_b = min(affordable, parallel_cap)

    if feat <= _LANES or tile_b * bytes_per_row_full_d <= budget:
        return tile_b, feat  # single feature chunk

    # D-tiling fallback: keep tile_b large, chunk the feature dim instead.
    scratch_bytes = 5 * tile_b * _LANES * 4  # lane-padded f32 accumulators
    avail = max(budget - scratch_bytes, 3 * num_buffers * tile_b * _LANES * itemsize)
    chunk_d = avail // (3 * num_buffers * tile_b * itemsize)
    chunk_d = max(_LANES, (chunk_d // _LANES) * _LANES)
    return tile_b, chunk_d


def _finalize_tile(asq, psq, nsq, pos_dot, neg_dot, tile_idx, batch, tile_b):
    """Per-row cosine triplet loss from the five row-wise reductions, masked past
    the true batch size and summed into one lane-dense (1, 8, 128) block."""
    # cos(x, y) = x.y / max(||x||*||y||, eps)
    #           = x.y * rsqrt(max(||x||^2 * ||y||^2, eps^2))
    # rsqrt runs on the EUP (free slot next to the VPU).  Note: ||x||^2*||y||^2
    # can only overflow f32 for ||x||*||y|| > ~1.8e19, which is acceptable here.
    pos_sim = pos_dot * lax.rsqrt(jnp.maximum(asq * psq, EPS * EPS))
    neg_sim = neg_dot * lax.rsqrt(jnp.maximum(asq * nsq, EPS * EPS))
    loss = jnp.maximum(neg_sim - pos_sim + MARGIN, 0.0)  # (tile_b, 1)

    # Mask rows past the true batch size (ragged last batch tile contributes 0).
    row = tile_idx * tile_b + lax.broadcasted_iota(jnp.int32, (tile_b, 1), 0)
    loss = jnp.where(row < batch, loss, 0.0)

    # Lane-dense, unmasked writeback (one vreg of identical values); the wrapper
    # reads [:, 0, 0] and finishes the mean outside the kernel.
    return jnp.full((1, _SUBLANES, _LANES), jnp.sum(loss), dtype=jnp.float32)


def _single_chunk_kernel(a_ref, p_ref, n_ref, partial_ref, *, batch, tile_b):
    """Full feature dim resident: one batch tile -> one partial-sum block."""
    i = pl.program_id(0)

    a = a_ref[...].astype(jnp.float32)
    p = p_ref[...].astype(jnp.float32)
    n = n_ref[...].astype(jnp.float32)

    asq = jnp.sum(a * a, axis=1, keepdims=True)
    psq = jnp.sum(p * p, axis=1, keepdims=True)
    nsq = jnp.sum(n * n, axis=1, keepdims=True)
    pos_dot = jnp.sum(a * p, axis=1, keepdims=True)
    neg_dot = jnp.sum(a * n, axis=1, keepdims=True)

    partial_ref[...] = _finalize_tile(asq, psq, nsq, pos_dot, neg_dot, i, batch, tile_b)


def _d_tiled_kernel(a_ref, p_ref, n_ref, partial_ref,
                    asq_ref, psq_ref, nsq_ref, pdot_ref, ndot_ref,
                    *, batch, feat, tile_b, chunk_d):
    """Feature dim tiled over a trailing reduction axis; row-wise dot products
    accumulate in VMEM scratch and are finalized on the last chunk."""
    i = pl.program_id(0)  # batch tile    ("parallel")
    k = pl.program_id(1)  # feature chunk ("arbitrary" reduction)

    @pl.when(k == 0)
    def _():
        zeros = jnp.zeros((tile_b, 1), jnp.float32)
        asq_ref[...] = zeros
        psq_ref[...] = zeros
        nsq_ref[...] = zeros
        pdot_ref[...] = zeros
        ndot_ref[...] = zeros

    a = a_ref[...].astype(jnp.float32)
    p = p_ref[...].astype(jnp.float32)
    n = n_ref[...].astype(jnp.float32)

    if feat % chunk_d != 0:
        # Ragged last feature chunk: zero columns past the true feature dim so
        # they do not pollute the running reductions.
        col = k * chunk_d + lax.broadcasted_iota(jnp.int32, (tile_b, chunk_d), 1)
        valid = col < feat
        a = jnp.where(valid, a, 0.0)
        p = jnp.where(valid, p, 0.0)
        n = jnp.where(valid, n, 0.0)

    asq_ref[...] += jnp.sum(a * a, axis=1, keepdims=True)
    psq_ref[...] += jnp.sum(p * p, axis=1, keepdims=True)
    nsq_ref[...] += jnp.sum(n * n, axis=1, keepdims=True)
    pdot_ref[...] += jnp.sum(a * p, axis=1, keepdims=True)
    ndot_ref[...] += jnp.sum(a * n, axis=1, keepdims=True)

    @pl.when(k == pl.num_programs(1) - 1)
    def _():
        partial_ref[...] = _finalize_tile(
            asq_ref[...], psq_ref[...], nsq_ref[...], pdot_ref[...], ndot_ref[...],
            i, batch, tile_b)


def cosine_triplet_loss(anchor, positive, negative, *, tile_b=None, chunk_d=None,
                        input_buffers=2):
    """Pallas TPU implementation of CosineTripletLoss(margin=0.1).forward."""
    assert anchor.shape == positive.shape == negative.shape
    assert anchor.ndim == 2
    B, D = anchor.shape

    itemsize = max(jnp.dtype(x.dtype).itemsize for x in (anchor, positive, negative))
    pack = _sublane_pack(itemsize)
    budget = _input_vmem_budget_bytes()
    auto_tile_b, auto_chunk_d = _plan_tiling(B, D, itemsize, budget,
                                             max(2, int(input_buffers)))

    if tile_b is None:
        tile_b = auto_tile_b
    else:
        tile_b = int(tile_b)
        # Partial blocks must respect the dtype's (pack, 128) sublane packing.
        tile_b = B if tile_b >= B else min(B, _round_up(max(tile_b, pack), pack))

    if chunk_d is None:
        chunk_d = auto_chunk_d
    else:
        chunk_d = _round_up(max(int(chunk_d), _LANES), _LANES)
        if chunk_d >= D:
            chunk_d = D

    num_b_tiles = pl.cdiv(B, tile_b)
    num_d_chunks = pl.cdiv(D, chunk_d)

    cost = pl.CostEstimate(
        flops=10 * B * D,            # 5 multiply-accumulate row reductions
        transcendentals=2 * B,       # 2 rsqrt per row
        bytes_accessed=3 * B * D * itemsize + num_b_tiles * _SUBLANES * _LANES * 4,
    )
    compiler_params = pltpu.CompilerParams(
        dimension_semantics=(("parallel",) if num_d_chunks == 1
                             else ("parallel", "arbitrary")),
        vmem_limit_bytes=budget + 8 * 1024 * 1024,
    )

    def make_in_spec(index_map):
        if input_buffers != 2:  # optional deeper input pipeline (e.g. v7x small tiles)
            return pl.BlockSpec((tile_b, chunk_d), index_map,
                                pipeline_mode=pl.Buffered(int(input_buffers)))
        return pl.BlockSpec((tile_b, chunk_d), index_map)

    out_shape = jax.ShapeDtypeStruct((num_b_tiles, _SUBLANES, _LANES), jnp.float32)

    if num_d_chunks == 1:
        kernel = functools.partial(_single_chunk_kernel, batch=B, tile_b=tile_b)
        partials = pl.pallas_call(
            kernel,
            out_shape=out_shape,
            grid=(num_b_tiles,),
            in_specs=[make_in_spec(lambda i: (i, 0))] * 3,
            out_specs=pl.BlockSpec((1, _SUBLANES, _LANES), lambda i: (i, 0, 0)),
            compiler_params=compiler_params,
            cost_estimate=cost,
        )(anchor, positive, negative)
    else:
        kernel = functools.partial(_d_tiled_kernel, batch=B, feat=D,
                                   tile_b=tile_b, chunk_d=chunk_d)
        partials = pl.pallas_call(
            kernel,
            out_shape=out_shape,
            grid=(num_b_tiles, num_d_chunks),
            in_specs=[make_in_spec(lambda i, k: (i, k))] * 3,
            out_specs=pl.BlockSpec((1, _SUBLANES, _LANES), lambda i, k: (i, 0, 0)),
            scratch_shapes=[pltpu.VMEM((tile_b, 1), jnp.float32)] * 5,
            compiler_params=compiler_params,
            cost_estimate=cost,
        )(anchor, positive, negative)

    # Tiny finalize outside the kernel: sum of per-tile partials / true batch size.
    return jnp.sum(partials[:, 0, 0]) / B


def _reference(anchor, positive, negative):
    a = anchor.astype(jnp.float32)
    p = positive.astype(jnp.float32)
    n = negative.astype(jnp.float32)

    def cos(x, y):
        num = jnp.sum(x * y, axis=1)
        den = jnp.maximum(jnp.linalg.norm(x, axis=1) * jnp.linalg.norm(y, axis=1), EPS)
        return num / den

    return jnp.mean(jnp.maximum(cos(a, n) - cos(a, p) + MARGIN, 0.0))


if __name__ == "__main__":
    key = jax.random.PRNGKey(0)
    keys = jax.random.split(key, 12)

    # Case 1: small single-block batch (matches the toy PyTorch usage).
    B, D = 8, 32
    a = jax.random.normal(keys[0], (B, D), dtype=jnp.float32)
    p = jax.random.normal(keys[1], (B, D), dtype=jnp.float32)
    n = jax.random.normal(keys[2], (B, D), dtype=jnp.float32)
    out = jax.block_until_ready(cosine_triplet_loss(a, p, n))
    ref = _reference(a, p, n)
    assert jnp.allclose(out, ref, atol=1e-5, rtol=1e-5), (out, ref)

    # Case 2: multi-tile batch grid with a ragged last tile (row-mask path).
    B2, D2 = 20, 32
    a2 = jax.random.normal(keys[3], (B2, D2), dtype=jnp.float32)
    p2 = jax.random.normal(keys[4], (B2, D2), dtype=jnp.float32)
    n2 = jax.random.normal(keys[5], (B2, D2), dtype=jnp.float32)
    out2 = jax.block_until_ready(cosine_triplet_loss(a2, p2, n2, tile_b=8))
    ref2 = _reference(a2, p2, n2)
    assert jnp.allclose(out2, ref2, atol=1e-5, rtol=1e-5), (out2, ref2)

    # Case 3: feature-dim tiling fallback with a ragged last D chunk.
    B3, D3 = 16, 160
    a3 = jax.random.normal(keys[6], (B3, D3), dtype=jnp.float32)
    p3 = jax.random.normal(keys[7], (B3, D3), dtype=jnp.float32)
    n3 = jax.random.normal(keys[8], (B3, D3), dtype=jnp.float32)
    out3 = jax.block_until_ready(cosine_triplet_loss(a3, p3, n3, chunk_d=128))
    ref3 = _reference(a3, p3, n3)
    assert jnp.allclose(out3, ref3, atol=1e-5, rtol=1e-5), (out3, ref3)

    # Case 4: bf16 inputs exercise the dtype-aware sublane packing (16-row tiles).
    B4, D4 = 64, 256
    a4 = jax.random.normal(keys[9], (B4, D4), dtype=jnp.bfloat16)
    p4 = jax.random.normal(keys[10], (B4, D4), dtype=jnp.bfloat16)
    n4 = jax.random.normal(keys[11], (B4, D4), dtype=jnp.bfloat16)
    out4 = jax.block_until_ready(cosine_triplet_loss(a4, p4, n4))
    ref4 = _reference(a4, p4, n4)
    assert jnp.allclose(out4, ref4, atol=1e-4, rtol=1e-4), (out4, ref4)

    print("KERNEL_OK")
</pallas_src>

<mosaic_0001>
module attributes {stable_mosaic.version = 11 : i64} {
  func.func @_single_chunk_kernel(%arg0: i32, %arg1: memref<8x32xf32, #tpu.memory_space<vmem>>, %arg2: memref<8x32xf32, #tpu.memory_space<vmem>>, %arg3: memref<8x32xf32, #tpu.memory_space<vmem>>, %arg4: memref<1x8x128xf32, #tpu.memory_space<vmem>>) attributes {dimension_semantics = [#tpu.dimension_semantics<parallel>], iteration_bounds = array<i64: 1>, scalar_prefetch = 0 : i64, scratch_operands = 0 : i64, tpu.core_type = #tpu.core_type<tc>, window_params = [{transform_indices = @transform_0, window_bounds = array<i64: 8, 32>}, {transform_indices = @transform_1, window_bounds = array<i64: 8, 32>}, {transform_indices = @transform_2, window_bounds = array<i64: 8, 32>}, {transform_indices = @transform_3, window_bounds = array<i64: 1, 8, 128>}]} {
    %c0 = arith.constant 0 : index
    %c0_0 = arith.constant 0 : index
    %0 = vector.load %arg1[%c0, %c0_0] : memref<8x32xf32, #tpu.memory_space<vmem>>, vector<8x32xf32>
    %c0_1 = arith.constant 0 : index
    %c0_2 = arith.constant 0 : index
    %1 = vector.load %arg2[%c0_1, %c0_2] : memref<8x32xf32, #tpu.memory_space<vmem>>, vector<8x32xf32>
    %c0_3 = arith.constant 0 : index
    %c0_4 = arith.constant 0 : index
    %2 = vector.load %arg3[%c0_3, %c0_4] : memref<8x32xf32, #tpu.memory_space<vmem>>, vector<8x32xf32>
    %3 = arith.mulf %0, %0 : vector<8x32xf32>
    %cst = arith.constant dense<0.000000e+00> : vector<8xf32>
    %4 = vector.multi_reduction <add>, %3, %cst [1] : vector<8x32xf32> to vector<8xf32>
    %5 = vector.shape_cast %4 : vector<8xf32> to vector<8x1xf32>
    %6 = arith.mulf %1, %1 : vector<8x32xf32>
    %cst_5 = arith.constant dense<0.000000e+00> : vector<8xf32>
    %7 = vector.multi_reduction <add>, %6, %cst_5 [1] : vector<8x32xf32> to vector<8xf32>
    %8 = vector.shape_cast %7 : vector<8xf32> to vector<8x1xf32>
    %9 = arith.mulf %2, %2 : vector<8x32xf32>
    %cst_6 = arith.constant dense<0.000000e+00> : vector<8xf32>
    %10 = vector.multi_reduction <add>, %9, %cst_6 [1] : vector<8x32xf32> to vector<8xf32>
    %11 = vector.shape_cast %10 : vector<8xf32> to vector<8x1xf32>
    %12 = arith.mulf %0, %1 : vector<8x32xf32>
    %cst_7 = arith.constant dense<0.000000e+00> : vector<8xf32>
    %13 = vector.multi_reduction <add>, %12, %cst_7 [1] : vector<8x32xf32> to vector<8xf32>
    %14 = vector.shape_cast %13 : vector<8xf32> to vector<8x1xf32>
    %15 = arith.mulf %0, %2 : vector<8x32xf32>
    %cst_8 = arith.constant dense<0.000000e+00> : vector<8xf32>
    %16 = vector.multi_reduction <add>, %15, %cst_8 [1] : vector<8x32xf32> to vector<8xf32>
    %17 = vector.shape_cast %16 : vector<8xf32> to vector<8x1xf32>
    %18 = arith.mulf %5, %8 : vector<8x1xf32>
    %cst_9 = arith.constant 9.99999996E-13 : f32
    %19 = vector.broadcast %cst_9 : f32 to vector<8x1xf32>
    %20 = arith.maximumf %18, %19 : vector<8x1xf32>
    %21 = math.rsqrt %20 : vector<8x1xf32>
    %22 = arith.mulf %14, %21 : vector<8x1xf32>
    %23 = arith.mulf %5, %11 : vector<8x1xf32>
    %cst_10 = arith.constant 9.99999996E-13 : f32
    %24 = vector.broadcast %cst_10 : f32 to vector<8x1xf32>
    %25 = arith.maximumf %23, %24 : vector<8x1xf32>
    %26 = math.rsqrt %25 : vector<8x1xf32>
    %27 = arith.mulf %17, %26 : vector<8x1xf32>
    %28 = arith.subf %27, %22 : vector<8x1xf32>
    %cst_11 = arith.constant 1.000000e-01 : f32
    %29 = vector.broadcast %cst_11 : f32 to vector<8x1xf32>
    %30 = arith.addf %28, %29 : vector<8x1xf32>
    %cst_12 = arith.constant 0.000000e+00 : f32
    %31 = vector.broadcast %cst_12 : f32 to vector<8x1xf32>
    %32 = arith.maximumf %30, %31 : vector<8x1xf32>
    %c8_i32 = arith.constant 8 : i32
    %33 = arith.muli %arg0, %c8_i32 : i32
    %34 = tpu.iota {dimensions = array<i32: 0>} : vector<8x1xi32>
    %35 = vector.broadcast %33 : i32 to vector<8x1xi32>
    %36 = arith.addi %35, %34 : vector<8x1xi32>
    %c8_i32_13 = arith.constant 8 : i32
    %37 = vector.broadcast %c8_i32_13 : i32 to vector<8x1xi32>
    %38 = arith.cmpi slt, %36, %37 : vector<8x1xi32>
    %cst_14 = arith.constant 0.000000e+00 : f32
    %39 = vector.broadcast %cst_14 : f32 to vector<8x1xf32>
    %40 = arith.select %38, %32, %39 : vector<8x1xi1>, vector<8x1xf32>
    %41 = vector.shape_cast %40 : vector<8x1xf32> to vector<1x8x1xf32>
    %cst_15 = arith.constant dense<0.000000e+00> : vector<1xf32>
    %42 = vector.multi_reduction <add>, %41, %cst_15 [1, 2] : vector<1x8x1xf32> to vector<1xf32>
    %43 = vector.shape_cast %42 : vector<1xf32> to vector<1x1x1xf32>
    %44 = vector.extract %43[0, 0, 0] : f32 from vector<1x1x1xf32>
    %45 = vector.broadcast %44 : f32 to vector<1x8x128xf32>
    %c0_16 = arith.constant 0 : index
    %c0_17 = arith.constant 0 : index
    %c0_18 = arith.constant 0 : index
    %46 = vector.load %arg4[%c0_16, %c0_17, %c0_18] : memref<1x8x128xf32, #tpu.memory_space<vmem>>, vector<1x8x128xf32>
    tpu.vector_store %arg4[%c0_16, %c0_17, %c0_18], %45 {strides = array<i32>} : memref<1x8x128xf32, #tpu.memory_space<vmem>>, vector<1x8x128xf32>,
    return
  }
  func.func @transform_0(%arg0: i32) -> (i32, i32) {
    %c0_i32 = arith.constant 0 : i32
    %c0_i32_0 = arith.constant 0 : i32
    return %arg0, %c0_i32 : i32, i32
  }
  func.func @transform_1(%arg0: i32) -> (i32, i32) {
    %c0_i32 = arith.constant 0 : i32
    %c0_i32_0 = arith.constant 0 : i32
    return %arg0, %c0_i32 : i32, i32
  }
  func.func @transform_2(%arg0: i32) -> (i32, i32) {
    %c0_i32 = arith.constant 0 : i32
    %c0_i32_0 = arith.constant 0 : i32
    return %arg0, %c0_i32 : i32, i32
  }
  func.func @transform_3(%arg0: i32) -> (i32, i32, i32) {
    %c0_i32 = arith.constant 0 : i32
    %c0_i32_0 = arith.constant 0 : i32
    %c0_i32_1 = arith.constant 0 : i32
    return %arg0, %c0_i32, %c0_i32_0 : i32, i32, i32
  }
}

</mosaic_0001>

<bundles_post_ra>
// kernel: tpu_custom_call.1
= control target key start
LH: loop header
LB: loop body
LE: loop exit
PB: predicated region body
PF: predicated region fallthrough
CT: control target
= control target key end

     0   :  { %8 = vsyncpa [#allocation3], 0  ;;  %s258_s0 = inlined_call_operand.hbm [shape: f32[8,32], index: 0, kind: input, shape index: {}]   ;;  %s259_s1 = inlined_call_operand.hbm [shape: f32[8,32], index: 1, kind: input, shape index: {}]   ;;  %s260_s2 = inlined_call_operand.hbm [shape: f32[8,32], index: 2, kind: input, shape index: {}]   ;;  %s261_s3 = inlined_call_operand.hbm [shape: f32[1,8,128], index: 3, kind: output, shape index: {}]  }
   0x1   :  { %9 = vsyncpa [#allocation6], 0 }
   0x2   :  { %10 = vsyncpa [#allocation4], 0  ;;  %s217_s12 = smov [#allocation5]   ;;  %s218_s14 = smov [#allocation2]  }
   0x3   :  { %s27_s13 = sshll.u32 %s217_s12, 4  ;;  %s17_s15 = sshll.u32 %s218_s14, 4  ;;  %s28_s13 = int_to_ptr.vmem [resolvable:$true] %s27_s13  ;;  %s18_s15 = int_to_ptr.vmem [resolvable:$true] %s17_s15 }
   0x4   :  { %s139_s16 = scalar_lea.vmem %s28_s13, 128  ;;  %p144_p1 = scmp.lt.s32.totalorder %s28_s13, %s28_s13 }
   0x5   :  { %p140_p0 = scmp.ne.s32.totalorder %s28_s13, %s139_s16  ;;  %p145_p2 = scmp.lt.s32.totalorder %s139_s16, %s139_s16 }
   0x7   :  { %p146_p3 = por %p145_p2, %p144_p1 }
   0x9   :  { %p147_p4 = pnand %p146_p3, %p140_p0 }
   0xb   :  { %150 = shalt.err (!%p147_p4)
}
   0xc   :  { %30 = dma.hbm_to_vmem [thread:$0]  %s259_s1, 128, %s28_s13, [#allocation6]  }
   0xd   :  { %s159_s19 = scalar_lea.vmem %s18_s15, 128  ;;  %p164_p6 = scmp.lt.s32.totalorder %s18_s15, %s18_s15 }
   0xe   :  { %p160_p5 = scmp.ne.s32.totalorder %s18_s15, %s159_s19  ;;  %p165_p7 = scmp.lt.s32.totalorder %s159_s19, %s159_s19 }
  0x10   :  { %p166_p8 = por %p165_p7, %p164_p6 }
  0x12   :  { %p167_p9 = pnand %p166_p8, %p160_p5 }
  0x14   :  { %170 = shalt.err (!%p167_p9)
}
  0x15   :  { %20 = dma.hbm_to_vmem [thread:$0]  %s258_s0, 128, %s18_s15, [#allocation3]  }
  0x16   :  { %s219_s22 = smov [#allocation7]  }
  0x17   :  { %s37_s23 = sshll.u32 %s219_s22, 4  ;;  %s38_s23 = int_to_ptr.vmem [resolvable:$true] %s37_s23 }
  0x18   :  { %s179_s24 = scalar_lea.vmem %s38_s23, 128  ;;  %p184_p11 = scmp.lt.s32.totalorder %s38_s23, %s38_s23 }
  0x19   :  { %p180_p10 = scmp.ne.s32.totalorder %s38_s23, %s179_s24  ;;  %p185_p12 = scmp.lt.s32.totalorder %s179_s24, %s179_s24 }
  0x1b   :  { %p186_p13 = por %p185_p12, %p184_p11 }
  0x1d   :  { %p187_p0 = pnand %p186_p13, %p180_p10 }
  0x1f   :  { %190 = shalt.err (!%p187_p0)
}
  0x20   :  { %40 = dma.hbm_to_vmem [thread:$0]  %s260_s2, 128, %s38_s23, [#allocation6]  }
  0x21   :  { %211 = dma.done.wait [#allocation3], 128  }
  0x22   :  { %212 = vsyncadd [#allocation3], 4294967168 }
  0x23   :  { %213 = dma.done.wait [#allocation6], 256  }
  0x24   :  { %214 = vsyncadd [#allocation6], 4294967040  ;;  %v52_v0 = vld [vmem:[#allocation7] sm:$0xff]  ;;  %vm54_vm0 = vcmask 261120   ;;  %v50_v1 = vld [vmem:[#allocation2] sm:$0xff]  ;;  %vm92_vm1 = vcmask 7168  }
  0x25   :  { %v51_v2 = vld [vmem:[#allocation5] sm:$0xff]  ;;  %v62_v3 = vmul.f32 %v52_v0, %v52_v0  ;;  %v53_v4 = vmul.f32 %v50_v1, %v50_v1  ;;  %v70_v10 = vmul.f32 %v52_v0, %v50_v1  ;;  %s220_s0 = smov [#allocation8]  }
  0x26   :  { %v58_v5 = vmul.f32 %v51_v2, %v51_v2  ;;  %v66_v6 = vmul.f32 %v51_v2, %v50_v1  ;;  %s111_s2 = sshll.u32 %s220_s0, 4  ;;  %s112_s2 = int_to_ptr.vmem [resolvable:$true] %s111_s2 }
  0x27   :  { %v63_v7 = vsel %vm54_vm0, %v62_v3, 0.0  ;;  %v55_v8 = vsel %vm54_vm0, %v53_v4, 0.0  ;;  %v71_v12 = vsel %vm54_vm0, %v70_v10, 0.0  ;;  %s191_s27 = scalar_lea.vmem %s112_s2, 128  ;;  %p196_p2 = scmp.lt.s32.totalorder %s112_s2, %s112_s2 }
  0x28   :  { %64 = vadd.xlane.f32.xlu1 %v63_v7  ;;  %56 = vadd.xlane.f32.xlu0 %v55_v8  ;;  %v59_v9 = vsel %vm54_vm0, %v58_v5, 0.0  ;;  %v67_v11 = vsel %vm54_vm0, %v66_v6, 0.0  ;;  %p192_p1 = scmp.ne.s32.totalorder %s112_s2, %s191_s27  ;;  %p197_p3 = scmp.lt.s32.totalorder %s191_s27, %s191_s27 }
  0x2a   :  { %p198_p4 = por %p197_p3, %p196_p2 }
  0x2c   :  { %60 = vadd.xlane.f32.xlu0 %v59_v9  ;;  %68 = vadd.xlane.f32.xlu1 %v67_v11  ;;  %p199_p5 = pnand %p198_p4, %p192_p1 }
  0x30   :  { %72 = vadd.xlane.f32.xlu0 %v71_v12 }
  0xb1   :  { %v65_v13 = vpop.xlane.xlu1 %64  ;;  %v57_v14 = vpop.xlane.xlu0 %56 }
  0xb2   :  { %v78_v15 = vmul.f32 %v65_v13, %v57_v14 }
  0xb4   :  { %v79_v16 = vmax.f32 %v78_v15, 1e-12 }
  0xb5   :  { %v61_v17 = vpop.xlane.xlu0 %60  ;;  %v69_v22 = vpop.xlane.xlu1 %68 }
  0xb6   :  { %v74_v18 = vmul.f32 %v61_v17, %v57_v14  ;;  %127 = vrsqrt.f32 %v79_v16 }
  0xb8   :  { %v75_v19 = vmax.f32 %v74_v18, 1e-12 }
  0xb9   :  { %v73_v21 = vpop.xlane.xlu0 %72 }
  0xba   :  { %129 = vrsqrt.f32 %v75_v19 }
  0xc3   :  { %v128_v20 = vpop.eup %127 }
  0xc4   :  { %v81_v24 = vmul.f32 %v128_v20, %v73_v21 }
  0xc7   :  { %v130_v23 = vpop.eup %129 }
  0xc8   :  { %v77_v25 = vmul.f32 %v130_v23, %v69_v22 }
  0xca   :  { %v82_v26 = vsub.f32 %v81_v24, %v77_v25 }
  0xcc   :  { %v83_v27 = vadd.f32 0.1, %v82_v26 }
  0xce   :  { %v84_v28 = vmax.f32 %v83_v27, 0.0 }
  0xd0   :  { %v93_v29 = vsel %vm92_vm1, %v84_v28, 0.0 }
  0xd1   :  { %94 = vadd.xlane.f32.xlu1 %v93_v29 }
 0x15a   :  { %v95_v30 = vpop.xlane.xlu1 %94 }
 0x15b   :  { %v96_v31 = vrot.slane %v95_v30, 4 }
 0x15d   :  { %v97_v32 = vadd.f32 %v96_v31, %v95_v30 }
 0x15f   :  { %v98_v33 = vrot.slane %v97_v32, 2 }
 0x161   :  { %v99_v34 = vadd.f32 %v98_v33, %v97_v32 }
 0x163   :  { %v100_v35 = vrot.slane %v99_v34, 1 }
 0x165   :  { %v101_v36 = vadd.f32 %v100_v35, %v99_v34 }
 0x167   :  { %121 = vpush %v101_v36 }
 0x198   :  { %s122_s26 = spop %121 }
 0x199   :  { %v103_v37 = vstv %s122_s26 }
 0x19a   :  { %104 = vst [vmem:[#allocation8] sm:$0xff] %v103_v37 }
 0x19b   :  { %202 = shalt.err (!%p199_p5)
}
 0x19c   :  { %114 = dma.vmem_to_hbm [thread:$0]  %s112_s2, 128, %s261_s3, [#allocation4]  }
 0x19d   :  { %215 = dma.done.wait [#allocation4], 128  }
 0x19e   :  { %216 = vsyncadd [#allocation4], 4294967168 }
 0x19f   :  { %118 = vsyncpa [#allocation3], 1 }
 0x1a0   :  { %119 = vsyncpa [#allocation6], 1 }
 0x1a1   :  { %120 = vsyncpa [#allocation4], 1 }

</bundles_post_ra>
